<compile_context>
chip_gen: v5e
topology: v5e:2x2
jax: 0.10.0
libtpu: 0.0.40
codegen_flags: <defaults>
</compile_context>

<pallas_src>
import functools
import math

import numpy as np
import jax
import jax.numpy as jnp
from jax.experimental import pallas as pl
from jax.experimental.pallas import tpu as pltpu

_SQRT_HALF = math.sqrt(0.5)
_MASK_BIAS = -1e30  # finite mask value: exp() underflows to 0, no NaN risk


def _round_up(n, m):
    return ((n + m - 1) // m) * m


# --------------------------------------------------------------------------- #
# Kernel
# --------------------------------------------------------------------------- #
def _attn_kernel(q_ref, k_ref, v_ref, wq_ref, bq_ref, wo_ref, bo_ref, bias_ref,
                 out_ref, attn_ref, *, apply_mask):
    # Block shapes:
    #   q    (Bblk, tq, C_pad)     raw queries (residual + projection input)
    #   k    (Bblk, E_pad, Tk_pad) keys     (compute dtype, e.g. bf16)
    #   v    (Bblk, Tk_pad, E_pad) values   (compute dtype)
    #   wq   (C_pad, E_pad)        query projection (compute dtype)
    #   bq   (1, E_pad)            f32
    #   wo   (E_pad, C_pad)        out projection, sqrt(Tk)*sqrt(0.5) folded in
    #   bo   (1, C_pad)            f32, sqrt(0.5) folded in
    #   bias (1, Tk_pad)           0 for valid key cols, -1e30 for padded cols
    q = q_ref[...]
    bb, tq, c_pad = q.shape
    mm_dtype = wq_ref.dtype  # MXU feed dtype (bf16 by default), f32 accumulation

    # In-kernel query projection (reuses the q block as the residual later).
    x = jnp.dot(q.reshape(bb * tq, c_pad).astype(mm_dtype), wq_ref[...],
                preferred_element_type=jnp.float32) + bq_ref[...]     # (bb*tq, E_pad)
    x = x.reshape(bb, tq, -1)

    # Attention scores on the MXU.
    scores = jnp.einsum('bqe,bek->bqk', x.astype(mm_dtype), k_ref[...],
                        preferred_element_type=jnp.float32)           # (bb, tq, Tk_pad)
    if apply_mask:  # static branch: only when Tk % 128 != 0
        scores = scores + bias_ref[...]                               # additive -1e30

    # Numerically stable softmax over the key axis, exact normalization.
    m = jnp.max(scores, axis=-1, keepdims=True)
    e = jnp.exp(scores - m)
    denom = jnp.sum(e, axis=-1, keepdims=True)
    p = e * (1.0 / denom)
    attn_ref[...] = p.astype(attn_ref.dtype)

    # Context + out projection; sqrt(Tk)*sqrt(0.5) is folded into Wo, sqrt(0.5)
    # into bo, and the residual is scaled in-register (free filler under MXU work).
    ctx = jnp.einsum('bqk,bke->bqe', p.astype(mm_dtype), v_ref[...],
                     preferred_element_type=jnp.float32)              # (bb, tq, E_pad)
    e_pad = ctx.shape[-1]
    o = jnp.dot(ctx.reshape(bb * tq, e_pad).astype(mm_dtype), wo_ref[...],
                preferred_element_type=jnp.float32) + bo_ref[...]     # (bb*tq, C_pad)
    o = o.reshape(bb, tq, c_pad)
    out_ref[...] = (o + q.astype(jnp.float32) * _SQRT_HALF).astype(out_ref.dtype)


# --------------------------------------------------------------------------- #
# Hardware-aware tiling helpers
# --------------------------------------------------------------------------- #
def _hw_params():
    """Return (scoped vmem limit in bytes, preferred MXU M tile)."""
    kind = ""
    try:
        kind = getattr(jax.devices()[0], "device_kind", "").lower()
    except Exception:
        pass

    phys_vmem = None
    try:
        info = pltpu.get_tpu_info()
        phys_vmem = int(getattr(info, "vmem_capacity_bytes"))
    except Exception:
        phys_vmem = None
    if not phys_vmem or phys_vmem <= 0:
        if any(t in kind for t in ("v5 lite", "v5lite", "v5e", "v6")):
            phys_vmem = 128 * 1024 * 1024
        else:
            phys_vmem = 64 * 1024 * 1024  # conservative (v7x-safe) default

    # ~25% headroom for compiler scratch; clamp to a sane range.
    vmem_limit = int(phys_vmem * 0.75)
    vmem_limit = max(32 * 1024 * 1024, min(vmem_limit, 100 * 1024 * 1024))

    # v6e/v7x MXUs are 256-wide in M; earlier generations are 128.
    mxu_m = 256 if ("v6" in kind or "v7" in kind) else 128
    return vmem_limit, mxu_m


def _choose_blocks(B, Tq, C_pad, E_pad, Tk_pad, compute_bytes, attn_bytes,
                   vmem_budget, mxu_m, batch_block, tq_block):
    """Pick (batch_block, tq_block) so double-buffered blocks fit the VMEM budget."""

    def step_bytes(bb, tqb):
        est = (
            2 * bb * tqb * C_pad * 4                   # query blocks (double buffered)
            + 2 * bb * tqb * C_pad * 4                 # output blocks
            + 2 * bb * tqb * Tk_pad * attn_bytes       # attn_scores blocks
            + 2 * bb * E_pad * Tk_pad * compute_bytes  # keys blocks
            + 2 * bb * Tk_pad * E_pad * compute_bytes  # values blocks
            + 2 * 2 * C_pad * E_pad * compute_bytes    # Wq + Wo blocks
            + bb * tqb * (E_pad + 3 * Tk_pad) * 4      # in-kernel f32 temporaries
        )
        return int(est * 1.15)                         # fudge for compiler scratch

    if tq_block is None:
        tqb = min(mxu_m, _round_up(Tq, 8))             # fill the MXU M dim, no more
        while tqb > 8 and step_bytes(1, tqb) > vmem_budget:
            tqb = max(8, _round_up(tqb // 2, 8))
        tq_block = tqb
    assert tq_block % 8 == 0 or tq_block == Tq

    if batch_block is None:
        batch_block = 1
        for cand in (8, 4, 2):                         # amortizes per-step overhead only
            if cand <= B and B % cand == 0 and step_bytes(cand, tq_block) <= vmem_budget:
                batch_block = cand
                break
    assert B % batch_block == 0
    return batch_block, tq_block


# --------------------------------------------------------------------------- #
# Wrapper
# --------------------------------------------------------------------------- #
def attention_layer(query, keys, values, wq, bq, wo, bo, *,
                    compute_dtype=jnp.bfloat16, attn_dtype=None,
                    batch_block=None, tq_block=None):
    """query: (B, Tq, C); keys: (B, E, Tk); values: (B, Tk, E).
    wq: (C, E), bq: (E,), wo: (E, C), bo: (C,)  (projections stored as x @ W + b).
    Returns (out (B, Tq, C), attn_scores (B, Tq, Tk))."""
    B, Tq, C = query.shape
    Bk, E, Tk = keys.shape
    assert Bk == B and values.shape == (B, Tk, E)
    assert wq.shape == (C, E) and bq.shape == (E,)
    assert wo.shape == (E, C) and bo.shape == (C,)

    out_dtype = query.dtype
    attn_dtype = out_dtype if attn_dtype is None else attn_dtype

    # Lane-dense padded extents: all kernel loads/stores are full 128-lane ops.
    E_pad, Tk_pad, C_pad = (_round_up(n, 128) for n in (E, Tk, C))

    # ---- hardware-aware tiling ----------------------------------------------
    vmem_limit, mxu_m = _hw_params()
    vmem_budget = int(vmem_limit * 0.8)
    compute_bytes = np.dtype(compute_dtype).itemsize
    attn_bytes = np.dtype(attn_dtype).itemsize
    batch_block, tq_block = _choose_blocks(
        B, Tq, C_pad, E_pad, Tk_pad, compute_bytes, attn_bytes,
        vmem_budget, mxu_m, batch_block, tq_block)
    Tq_pad = _round_up(Tq, tq_block)

    # ---- tiny grid-invariant parameter prep (scales folded into Wo / bo) -----
    scale = math.sqrt(Tk) * _SQRT_HALF   # (Tk*sqrt(1/Tk)) * sqrt(0.5)

    def pad2(a, r, c):
        if a.shape == (r, c):
            return a
        return jnp.pad(a, ((0, r - a.shape[0]), (0, c - a.shape[1])))

    wq_p = pad2(wq.astype(compute_dtype), C_pad, E_pad)
    bq_p = pad2(bq.reshape(1, E).astype(jnp.float32), 1, E_pad)
    wo_p = pad2((wo * scale).astype(compute_dtype), E_pad, C_pad)
    bo_p = pad2((bo * _SQRT_HALF).reshape(1, C).astype(jnp.float32), 1, C_pad)

    # ---- activations (cast to the MXU feed dtype first, then zero-pad) -------
    q_p = query
    if (Tq_pad, C_pad) != (Tq, C):
        q_p = jnp.pad(q_p, ((0, 0), (0, Tq_pad - Tq), (0, C_pad - C)))
    k_p = keys.astype(compute_dtype)
    if (E_pad, Tk_pad) != (E, Tk):
        k_p = jnp.pad(k_p, ((0, 0), (0, E_pad - E), (0, Tk_pad - Tk)))
    v_p = values.astype(compute_dtype)
    if (Tk_pad, E_pad) != (Tk, E):
        v_p = jnp.pad(v_p, ((0, 0), (0, Tk_pad - Tk), (0, E_pad - E)))

    # Finite additive mask for zero-padded key columns (0 valid / -1e30 padded).
    apply_mask = (Tk_pad != Tk)
    mask_bias = jnp.where(
        jax.lax.broadcasted_iota(jnp.int32, (1, Tk_pad), 1) < Tk,
        0.0, _MASK_BIAS).astype(jnp.float32)

    grid = (B // batch_block, Tq_pad // tq_block)

    grid_spec = pltpu.PrefetchScalarGridSpec(
        num_scalar_prefetch=0,
        grid=grid,
        in_specs=[
            pl.BlockSpec((batch_block, tq_block, C_pad), lambda b, q: (b, q, 0)),   # query
            pl.BlockSpec((batch_block, E_pad, Tk_pad), lambda b, q: (b, 0, 0)),     # keys
            pl.BlockSpec((batch_block, Tk_pad, E_pad), lambda b, q: (b, 0, 0)),     # values
            pl.BlockSpec((C_pad, E_pad), lambda b, q: (0, 0)),                      # Wq
            pl.BlockSpec((1, E_pad), lambda b, q: (0, 0)),                          # bq
            pl.BlockSpec((E_pad, C_pad), lambda b, q: (0, 0)),                      # Wo'
            pl.BlockSpec((1, C_pad), lambda b, q: (0, 0)),                          # bo'
            pl.BlockSpec((1, Tk_pad), lambda b, q: (0, 0)),                         # mask bias
        ],
        out_specs=[
            pl.BlockSpec((batch_block, tq_block, C_pad), lambda b, q: (b, q, 0)),
            pl.BlockSpec((batch_block, tq_block, Tk_pad), lambda b, q: (b, q, 0)),
        ],
    )

    # Megacore: shard the batch axis so each core fetches K/V once per batch
    # block; only open the q axis up when there are not enough batch blocks.
    dim_sem = ("parallel", "arbitrary") if grid[0] >= 2 else ("parallel", "parallel")

    out_p, attn_p = pl.pallas_call(
        functools.partial(_attn_kernel, apply_mask=apply_mask),
        out_shape=(
            jax.ShapeDtypeStruct((B, Tq_pad, C_pad), out_dtype),
            jax.ShapeDtypeStruct((B, Tq_pad, Tk_pad), attn_dtype),
        ),
        grid_spec=grid_spec,
        compiler_params=pltpu.CompilerParams(
            dimension_semantics=dim_sem,
            vmem_limit_bytes=vmem_limit,
        ),
    )(q_p, k_p, v_p, wq_p, bq_p, wo_p, bo_p, mask_bias)

    # Drop the lane / Tq padding outside the kernel.
    return out_p[:, :Tq, :C], attn_p[:, :Tq, :Tk]


# --------------------------------------------------------------------------- #
# Pure-JAX reference (mirrors the PyTorch module, eval mode, last_attended=None)
# --------------------------------------------------------------------------- #
def _reference(query, keys, values, wq, bq, wo, bo):
    x = jnp.einsum("btc,ce->bte", query, wq) + bq
    s = jnp.einsum("bte,bek->btk", x, keys)
    p = jax.nn.softmax(s, axis=-1)
    tk = values.shape[1]
    c = jnp.einsum("btk,bke->bte", p, values) * (tk * math.sqrt(1.0 / tk))
    o = jnp.einsum("bte,ec->btc", c, wo) + bo
    out = (o + query) * math.sqrt(0.5)
    return out, p


if __name__ == "__main__":
    # Small, module-consistent shapes.
    B, Tq, Tk = 2, 8, 16
    conv_channels, embed_dim = 32, 16

    key = jax.random.PRNGKey(0)
    k1, k2, k3, k4, k5, k6, k7 = jax.random.split(key, 7)

    query = jax.random.normal(k1, (B, Tq, conv_channels), dtype=jnp.float32)
    keys = jax.random.normal(k2, (B, embed_dim, Tk), dtype=jnp.float32)
    values = jax.random.normal(k3, (B, Tk, embed_dim), dtype=jnp.float32)

    # Deterministic parameters (query_projection: C->E, out_projection: E->C).
    wq = jax.random.normal(k4, (conv_channels, embed_dim), dtype=jnp.float32) * 0.1
    bq = jax.random.normal(k5, (embed_dim,), dtype=jnp.float32) * 0.01
    wo = jax.random.normal(k6, (embed_dim, conv_channels), dtype=jnp.float32) * 0.1
    bo = jax.random.normal(k7, (conv_channels,), dtype=jnp.float32) * 0.01

    out, attn = attention_layer(query, keys, values, wq, bq, wo, bo)
    jax.block_until_ready((out, attn))

    out_ref, attn_ref = _reference(query, keys, values, wq, bq, wo, bo)

    assert out.shape == (B, Tq, conv_channels) and attn.shape == (B, Tq, Tk)
    # bf16 MXU feeds (per perf review) with f32 accumulation: expect ~1e-2-level
    # deviations vs. the pure-f32 reference, dominated by exp() amplifying the
    # bf16-rounded attention scores.  Softmax normalization itself is exact.
    assert jnp.allclose(out, out_ref, atol=3e-2, rtol=3e-2), "output mismatch"
    assert jnp.allclose(attn, attn_ref, atol=3e-2, rtol=3e-2), "attn mismatch"

    print("KERNEL_OK")
</pallas_src>

<mosaic_0001>
module attributes {stable_mosaic.version = 11 : i64} {
  func.func @_attn_kernel(%arg0: i32, %arg1: i32, %arg2: memref<2x8x128xf32, #tpu.memory_space<vmem>>, %arg3: memref<2x128x128xbf16, #tpu.memory_space<vmem>>, %arg4: memref<2x128x128xbf16, #tpu.memory_space<vmem>>, %arg5: memref<128x128xbf16, #tpu.memory_space<vmem>>, %arg6: memref<1x128xf32, #tpu.memory_space<vmem>>, %arg7: memref<128x128xbf16, #tpu.memory_space<vmem>>, %arg8: memref<1x128xf32, #tpu.memory_space<vmem>>, %arg9: memref<1x128xf32, #tpu.memory_space<vmem>>, %arg10: memref<2x8x128xf32, #tpu.memory_space<vmem>>, %arg11: memref<2x8x128xf32, #tpu.memory_space<vmem>>) attributes {dimension_semantics = [#tpu.dimension_semantics<parallel>, #tpu.dimension_semantics<parallel>], iteration_bounds = array<i64: 1, 1>, scalar_prefetch = 0 : i64, scratch_operands = 0 : i64, tpu.core_type = #tpu.core_type<tc>, window_params = [{transform_indices = @transform_0, window_bounds = array<i64: 2, 8, 128>}, {transform_indices = @transform_1, window_bounds = array<i64: 2, 128, 128>}, {transform_indices = @transform_2, window_bounds = array<i64: 2, 128, 128>}, {pipeline_mode = #tpu.pipeline_mode<synchronous>, transform_indices = @transform_3, window_bounds = array<i64: 128, 128>}, {pipeline_mode = #tpu.pipeline_mode<synchronous>, transform_indices = @transform_4, window_bounds = array<i64: 1, 128>}, {pipeline_mode = #tpu.pipeline_mode<synchronous>, transform_indices = @transform_5, window_bounds = array<i64: 128, 128>}, {pipeline_mode = #tpu.pipeline_mode<synchronous>, transform_indices = @transform_6, window_bounds = array<i64: 1, 128>}, {pipeline_mode = #tpu.pipeline_mode<synchronous>, transform_indices = @transform_7, window_bounds = array<i64: 1, 128>}, {transform_indices = @transform_8, window_bounds = array<i64: 2, 8, 128>}, {transform_indices = @transform_9, window_bounds = array<i64: 2, 8, 128>}]} {
    %c0 = arith.constant 0 : index
    %c0_0 = arith.constant 0 : index
    %c0_1 = arith.constant 0 : index
    %0 = vector.load %arg2[%c0, %c0_0, %c0_1] : memref<2x8x128xf32, #tpu.memory_space<vmem>>, vector<2x8x128xf32>
    %1 = vector.shape_cast %0 : vector<2x8x128xf32> to vector<16x128xf32>
    %2 = arith.truncf %1 : vector<16x128xf32> to vector<16x128xbf16>
    %c0_2 = arith.constant 0 : index
    %c0_3 = arith.constant 0 : index
    %3 = vector.load %arg5[%c0_2, %c0_3] : memref<128x128xbf16, #tpu.memory_space<vmem>>, vector<128x128xbf16>
    %cst = arith.constant dense<0.000000e+00> : vector<16x128xf32>
    %4 = tpu.matmul %2, %3, %cst {dimension_numbers = #tpu.dot_dimension_numbers<[1], [0], [0], [1], [0, 0, 1, 1], [], []>} : vector<16x128xbf16>, vector<128x128xbf16>, vector<16x128xf32> -> vector<16x128xf32>
    %c0_4 = arith.constant 0 : index
    %c0_5 = arith.constant 0 : index
    %5 = vector.load %arg6[%c0_4, %c0_5] : memref<1x128xf32, #tpu.memory_space<vmem>>, vector<1x128xf32>
    %6 = vector.broadcast %5 : vector<1x128xf32> to vector<16x128xf32>
    %7 = arith.addf %4, %6 : vector<16x128xf32>
    %8 = vector.shape_cast %7 : vector<16x128xf32> to vector<2x8x128xf32>
    %9 = arith.truncf %8 : vector<2x8x128xf32> to vector<2x8x128xbf16>
    %c0_6 = arith.constant 0 : index
    %c0_7 = arith.constant 0 : index
    %c0_8 = arith.constant 0 : index
    %10 = vector.load %arg3[%c0_6, %c0_7, %c0_8] : memref<2x128x128xbf16, #tpu.memory_space<vmem>>, vector<2x128x128xbf16>
    "tpu.trace_start"() <{level = 10 : i32, message = "bqe,bek->bqk"}> : () -> ()
    %cst_9 = arith.constant dense<0.000000e+00> : vector<2x8x128xf32>
    %11 = tpu.matmul %9, %10, %cst_9 {dimension_numbers = #tpu.dot_dimension_numbers<[2], [1], [1], [2], [0, 0, 0, 1, 1, 2], [0], [0]>} : vector<2x8x128xbf16>, vector<2x128x128xbf16>, vector<2x8x128xf32> -> vector<2x8x128xf32>
    "tpu.trace_stop"() : () -> ()
    %c0_10 = arith.constant 0 : index
    %c0_11 = arith.constant 0 : index
    %12 = vector.load %arg9[%c0_10, %c0_11] : memref<1x128xf32, #tpu.memory_space<vmem>>, vector<1x128xf32>
    %13 = vector.shape_cast %12 : vector<1x128xf32> to vector<1x1x128xf32>
    %14 = vector.broadcast %13 : vector<1x1x128xf32> to vector<2x8x128xf32>
    %15 = arith.addf %11, %14 : vector<2x8x128xf32>
    %cst_12 = arith.constant dense<0xFF800000> : vector<2x8xf32>
    %16 = vector.multi_reduction <maximumf>, %15, %cst_12 [2] : vector<2x8x128xf32> to vector<2x8xf32>
    %17 = vector.shape_cast %16 : vector<2x8xf32> to vector<2x8x1xf32>
    %18 = vector.broadcast %17 : vector<2x8x1xf32> to vector<2x8x128xf32>
    %19 = arith.subf %15, %18 : vector<2x8x128xf32>
    %20 = math.exp %19 : vector<2x8x128xf32>
    %cst_13 = arith.constant dense<0.000000e+00> : vector<2x8xf32>
    %21 = vector.multi_reduction <add>, %20, %cst_13 [2] : vector<2x8x128xf32> to vector<2x8xf32>
    %22 = vector.shape_cast %21 : vector<2x8xf32> to vector<2x8x1xf32>
    %cst_14 = arith.constant 1.000000e+00 : f32
    %23 = vector.broadcast %cst_14 : f32 to vector<2x8x1xf32>
    %24 = arith.divf %23, %22 : vector<2x8x1xf32>
    %25 = vector.broadcast %24 : vector<2x8x1xf32> to vector<2x8x128xf32>
    %26 = arith.mulf %20, %25 : vector<2x8x128xf32>
    %c0_15 = arith.constant 0 : index
    %c0_16 = arith.constant 0 : index
    %c0_17 = arith.constant 0 : index
    %27 = vector.load %arg11[%c0_15, %c0_16, %c0_17] : memref<2x8x128xf32, #tpu.memory_space<vmem>>, vector<2x8x128xf32>
    tpu.vector_store %arg11[%c0_15, %c0_16, %c0_17], %26 {strides = array<i32>} : memref<2x8x128xf32, #tpu.memory_space<vmem>>, vector<2x8x128xf32>,
    %28 = arith.truncf %26 : vector<2x8x128xf32> to vector<2x8x128xbf16>
    %c0_18 = arith.constant 0 : index
    %c0_19 = arith.constant 0 : index
    %c0_20 = arith.constant 0 : index
    %29 = vector.load %arg4[%c0_18, %c0_19, %c0_20] : memref<2x128x128xbf16, #tpu.memory_space<vmem>>, vector<2x128x128xbf16>
    "tpu.trace_start"() <{level = 10 : i32, message = "bqk,bke->bqe"}> : () -> ()
    %cst_21 = arith.constant dense<0.000000e+00> : vector<2x8x128xf32>
    %30 = tpu.matmul %28, %29, %cst_21 {dimension_numbers = #tpu.dot_dimension_numbers<[2], [1], [1], [2], [0, 0, 0, 1, 1, 2], [0], [0]>} : vector<2x8x128xbf16>, vector<2x128x128xbf16>, vector<2x8x128xf32> -> vector<2x8x128xf32>
    "tpu.trace_stop"() : () -> ()
    %31 = vector.shape_cast %30 : vector<2x8x128xf32> to vector<16x128xf32>
    %32 = arith.truncf %31 : vector<16x128xf32> to vector<16x128xbf16>
    %c0_22 = arith.constant 0 : index
    %c0_23 = arith.constant 0 : index
    %33 = vector.load %arg7[%c0_22, %c0_23] : memref<128x128xbf16, #tpu.memory_space<vmem>>, vector<128x128xbf16>
    %cst_24 = arith.constant dense<0.000000e+00> : vector<16x128xf32>
    %34 = tpu.matmul %32, %33, %cst_24 {dimension_numbers = #tpu.dot_dimension_numbers<[1], [0], [0], [1], [0, 0, 1, 1], [], []>} : vector<16x128xbf16>, vector<128x128xbf16>, vector<16x128xf32> -> vector<16x128xf32>
    %c0_25 = arith.constant 0 : index
    %c0_26 = arith.constant 0 : index
    %35 = vector.load %arg8[%c0_25, %c0_26] : memref<1x128xf32, #tpu.memory_space<vmem>>, vector<1x128xf32>
    %36 = vector.broadcast %35 : vector<1x128xf32> to vector<16x128xf32>
    %37 = arith.addf %34, %36 : vector<16x128xf32>
    %38 = vector.shape_cast %37 : vector<16x128xf32> to vector<2x8x128xf32>
    %cst_27 = arith.constant 0.707106769 : f32
    %39 = vector.broadcast %cst_27 : f32 to vector<2x8x128xf32>
    %40 = arith.mulf %0, %39 : vector<2x8x128xf32>
    %41 = arith.addf %38, %40 : vector<2x8x128xf32>
    %c0_28 = arith.constant 0 : index
    %c0_29 = arith.constant 0 : index
    %c0_30 = arith.constant 0 : index
    %42 = vector.load %arg10[%c0_28, %c0_29, %c0_30] : memref<2x8x128xf32, #tpu.memory_space<vmem>>, vector<2x8x128xf32>
    tpu.vector_store %arg10[%c0_28, %c0_29, %c0_30], %41 {strides = array<i32>} : memref<2x8x128xf32, #tpu.memory_space<vmem>>, vector<2x8x128xf32>,
    return
  }
  func.func @transform_0(%arg0: i32, %arg1: i32) -> (i32, i32, i32) {
    %c0_i32 = arith.constant 0 : i32
    %c0_i32_0 = arith.constant 0 : i32
    return %arg0, %arg1, %c0_i32 : i32, i32, i32
  }
  func.func @transform_1(%arg0: i32, %arg1: i32) -> (i32, i32, i32) {
    %c0_i32 = arith.constant 0 : i32
    %c0_i32_0 = arith.constant 0 : i32
    %c0_i32_1 = arith.constant 0 : i32
    return %arg0, %c0_i32, %c0_i32_0 : i32, i32, i32
  }
  func.func @transform_2(%arg0: i32, %arg1: i32) -> (i32, i32, i32) {
    %c0_i32 = arith.constant 0 : i32
    %c0_i32_0 = arith.constant 0 : i32
    %c0_i32_1 = arith.constant 0 : i32
    return %arg0, %c0_i32, %c0_i32_0 : i32, i32, i32
  }
  func.func @transform_3(%arg0: i32, %arg1: i32) -> (i32, i32) {
    %c0_i32 = arith.constant 0 : i32
    %c0_i32_0 = arith.constant 0 : i32
    %c0_i32_1 = arith.constant 0 : i32
    return %c0_i32, %c0_i32_0 : i32, i32
  }
  func.func @transform_4(%arg0: i32, %arg1: i32) -> (i32, i32) {
    %c0_i32 = arith.constant 0 : i32
    %c0_i32_0 = arith.constant 0 : i32
    %c0_i32_1 = arith.constant 0 : i32
    return %c0_i32, %c0_i32_0 : i32, i32
  }
  func.func @transform_5(%arg0: i32, %arg1: i32) -> (i32, i32) {
    %c0_i32 = arith.constant 0 : i32
    %c0_i32_0 = arith.constant 0 : i32
    %c0_i32_1 = arith.constant 0 : i32
    return %c0_i32, %c0_i32_0 : i32, i32
  }
  func.func @transform_6(%arg0: i32, %arg1: i32) -> (i32, i32) {
    %c0_i32 = arith.constant 0 : i32
    %c0_i32_0 = arith.constant 0 : i32
    %c0_i32_1 = arith.constant 0 : i32
    return %c0_i32, %c0_i32_0 : i32, i32
  }
  func.func @transform_7(%arg0: i32, %arg1: i32) -> (i32, i32) {
    %c0_i32 = arith.constant 0 : i32
    %c0_i32_0 = arith.constant 0 : i32
    %c0_i32_1 = arith.constant 0 : i32
    return %c0_i32, %c0_i32_0 : i32, i32
  }
  func.func @transform_8(%arg0: i32, %arg1: i32) -> (i32, i32, i32) {
    %c0_i32 = arith.constant 0 : i32
    %c0_i32_0 = arith.constant 0 : i32
    return %arg0, %arg1, %c0_i32 : i32, i32, i32
  }
  func.func @transform_9(%arg0: i32, %arg1: i32) -> (i32, i32, i32) {
    %c0_i32 = arith.constant 0 : i32
    %c0_i32_0 = arith.constant 0 : i32
    return %arg0, %arg1, %c0_i32 : i32, i32, i32
  }
}

</mosaic_0001>

<bundles_post_ra>
// kernel: tpu_custom_call.1
= control target key start
LH: loop header
LB: loop body
LE: loop exit
PB: predicated region body
PF: predicated region fallthrough
CT: control target
= control target key end

     0   :  { %15 = vsyncpa [#allocation3], 0  ;;  %s1252_s0 = inlined_call_operand.hbm [shape: f32[2,8,128], index: 0, kind: input, shape index: {}]   ;;  %s1253_s1 = inlined_call_operand.hbm [shape: bf16[2,128,128], index: 1, kind: input, shape index: {}]   ;;  %s1254_s2 = inlined_call_operand.hbm [shape: bf16[2,128,128], index: 2, kind: input, shape index: {}]   ;;  %s1255_s3 = inlined_call_operand.hbm [shape: bf16[128,128], index: 3, kind: input, shape index: {}]   ;;  %s1256_s4 = inlined_call_operand.vmem [shape: f32[1,128], index: 4, kind: input, shape index: {}]   ;;  %s1257_s5 = inlined_call_operand.hbm [shape: bf16[128,128], index: 5, kind: input, shape index: {}]   ;;  %s1258_s6 = inlined_call_operand.vmem [shape: f32[1,128], index: 6, kind: input, shape index: {}]   ;;  %s1259_s7 = inlined_call_operand.vmem [shape: f32[1,128], index: 7, kind: input, shape index: {}]   ;;  %s1260_s8 = inlined_call_operand.hbm [shape: f32[2,8,128], index: 8, kind: output, shape index: {0}]   ;;  %s1261_s9 = inlined_call_operand.hbm [shape: f32[2,8,128], index: 9, kind: output, shape index: {1}]  }
   0x1   :  { %16 = vsyncpa [#allocation6], 0 }
   0x2   :  { %17 = vsyncpa [#allocation9], 0 }
   0x3   :  { %18 = vsyncpa [#allocation4], 0  ;;  %s37_s11 = sshll.u32 %s1253_s1, 4  ;;  %s38_s11 = int_to_ptr.hbm [resolvable:$true] %s37_s11 }
   0x4   :  { %19 = vsyncpa [#allocation13], 0  ;;  %s1128_s12 = smov [#allocation5]   ;;  %s63_s16 = sshll.u32 %s1255_s3, 4  ;;  %s64_s16 = int_to_ptr.hbm [resolvable:$true] %s63_s16 }
   0x5   :  { %s39_s13 = sshll.u32 %s1128_s12, 4  ;;  %s1129_s17 = smov 64   ;;  %s40_s13 = int_to_ptr.vmem [resolvable:$true] %s39_s13 }
   0x6   :  { %s1130_s18 = smov 4   ;;  %s1131_s19 = smov [#allocation8]  }
   0x7   :  { %45 = dma.hbm_to_vmem [thread:$0]  %s38_s11, 2048, %s40_s13, [#allocation6], %s1129_s17, %s1129_s17, %s1130_s18  }
   0x8   :  { %s65_s20 = sshll.u32 %s1131_s19, 4  ;;  %s24_s22 = sshll.u32 %s1252_s0, 4  ;;  %s66_s20 = int_to_ptr.vmem [resolvable:$true] %s65_s20  ;;  %s25_s22 = int_to_ptr.hbm [resolvable:$true] %s24_s22 }
   0x9   :  { %71 = dma.hbm_to_vmem [thread:$0]  %s64_s16, 1024, %s66_s20, [#allocation9], %s1129_s17, %s1129_s17, %s1130_s18  }
   0xa   :  { %s1132_s3 = smov [#allocation2]   ;;  %s50_s26 = sshll.u32 %s1254_s2, 4  ;;  %s51_s26 = int_to_ptr.hbm [resolvable:$true] %s50_s26 }
   0xb   :  { %s26_s23 = sshll.u32 %s1132_s3, 4  ;;  %s1133_s27 = smov 128   ;;  %s27_s23 = int_to_ptr.vmem [resolvable:$true] %s26_s23 }
   0xc   :  { %s1134_s28 = smov 8   ;;  %s1135_s0 = smov [#allocation7]  }
   0xd   :  { %32 = dma.hbm_to_vmem [thread:$0]  %s25_s22, 256, %s27_s23, [#allocation3], %s1133_s27, %s1133_s27, %s1134_s28  }
   0xe   :  { %s52_s29 = sshll.u32 %s1135_s0, 4  ;;  %s78_s11 = sshll.u32 %s1257_s5, 4  ;;  %s53_s29 = int_to_ptr.vmem [resolvable:$true] %s52_s29  ;;  %s79_s11 = int_to_ptr.hbm [resolvable:$true] %s78_s11 }
   0xf   :  { %58 = dma.hbm_to_vmem [thread:$0]  %s51_s26, 2048, %s53_s29, [#allocation6], %s1129_s17, %s1129_s17, %s1130_s18  }
  0x10   :  { %s1136_s2 = smov [#allocation10]  }
  0x11   :  { %s80_s12 = sshll.u32 %s1136_s2, 4  ;;  %s81_s12 = int_to_ptr.vmem [resolvable:$true] %s80_s12 }
  0x12   :  { %86 = dma.hbm_to_vmem [thread:$0]  %s79_s11, 1024, %s81_s12, [#allocation9], %s1129_s17, %s1129_s17, %s1130_s18  }
  0x13   :  { %1118 = dma.done.wait [#allocation3], 256  }
  0x14   :  { %1119 = vsyncadd [#allocation3], 4294967040 }
  0x15   :  { %1120 = dma.done.wait [#allocation6], 4096  }
  0x16   :  { %1121 = vsyncadd [#allocation6], 4294963200 }
  0x17   :  { %1122 = dma.done.wait [#allocation9], 2048  }
  0x18   :  { %1123 = vsyncadd [#allocation9], 4294965248  ;;  %v887_v0 = vld [vmem:[#allocation8 + $0x38] sm:$0xff]  ;;  %v886_v1 = vld [vmem:[#allocation8 + $0x30] sm:$0xff]  ;;  %s668_s18 = sshll.u32 %s1261_s9, 4  ;;  %s1138_s9 = smov [#allocation11]   ;;  %s669_s18 = int_to_ptr.hbm [resolvable:$true] %s668_s18 }
  0x19   :  { %182 = vmatpush.bf16.msra.mxu0 %v887_v0  ;;  %v895_v2 = vld [vmem:[#allocation5 + $0x38] sm:$0xff]  ;;  %v894_v4 = vld [vmem:[#allocation5 + $0x30] sm:$0xff]  ;;  %v885_v5 = vld [vmem:[#allocation8 + $0x28] sm:$0xff]  ;;  %s653_s21 = sshll.u32 %s1138_s9, 4  ;;  %s655_s3 = sshll.u32 %s1260_s8, 4  ;;  %s654_s21 = int_to_ptr.vmem [resolvable:$true] %s653_s21  ;;  %s656_s3 = int_to_ptr.hbm [resolvable:$true] %s655_s3 }
  0x1a   :  { %v903_v3 = vld [vmem:[#allocation5 + $0x78] sm:$0xff]  ;;  %282 = vmatpush.bf16.msra.mxu1 %v895_v2  ;;  %v902_v6 = vld [vmem:[#allocation5 + $0x70] sm:$0xff]  ;;  %v893_v7 = vld [vmem:[#allocation5 + $0x28] sm:$0xff] }
  0x1b   :  { %343 = vmatpush.bf16.msra.mxu2 %v903_v3  ;;  %v884_v8 = vld [vmem:[#allocation8 + $0x20] sm:$0xff]  ;;  %v901_v9 = vld [vmem:[#allocation5 + $0x68] sm:$0xff]  ;;  %v883_v11 = vld [vmem:[#allocation8 + $0x18] sm:$0xff] }
  0x1c   :  { %v892_v10 = vld [vmem:[#allocation5 + $0x20] sm:$0xff]  ;;  %v891_v13 = vld [vmem:[#allocation5 + $0x18] sm:$0xff]  ;;  %v882_v14 = vld [vmem:[#allocation8 + $0x10] sm:$0xff] }
  0x1d   :  { %183 = vmatpush.bf16.msra.mxu0 %v886_v1  ;;  %v900_v12 = vld [vmem:[#allocation5 + $0x60] sm:$0xff]  ;;  %v899_v15 = vld [vmem:[#allocation5 + $0x58] sm:$0xff]  ;;  %v890_v16 = vld [vmem:[#allocation5 + $0x10] sm:$0xff] }
  0x1e   :  { %283 = vmatpush.bf16.msra.mxu1 %v894_v4  ;;  %v881_v17 = vld [vmem:[#allocation8 + $0x8] sm:$0xff]  ;;  %v880_v19 = vld [vmem:[#allocation8] sm:$0xff]  ;;  %v1219_v20 = vld [vmem:[#allocation2] sm:$0xff] }
  0x1f   :  { %344 = vmatpush.bf16.msra.mxu2 %v902_v6  ;;  %v889_v18 = vld [vmem:[#allocation5 + $0x8] sm:$0xff]  ;;  %v1221_v21 = vld [vmem:[#allocation2 + $0x8] sm:$0xff]  ;;  %v888_v23 = vld [vmem:[#allocation5] sm:$0xff] }
  0x20   :  { %v113_v22 = vpack.c.bf16 %v1221_v21, %v1219_v20  ;;  %v898_v24 = vld [vmem:[#allocation5 + $0x50] sm:$0xff]  ;;  %v897_v25 = vld [vmem:[#allocation5 + $0x48] sm:$0xff]  ;;  %v896_v26 = vld [vmem:[#allocation5 + $0x40] sm:$0xff] }
  0x21   :  { %184 = vmatpush.bf16.msra.mxu0 %v885_v5  ;;  %v939_v27 = vld [vmem:[%s1256_s4] ss:$0 sm:$0xff]  ;;  %v911_v41 = vld [vmem:[#allocation7 + $0x38] sm:$0xff]  ;;  %v909_v44 = vld [vmem:[#allocation7 + $0x28] sm:$0xff]  ;;  %s1137_s4 = smov [#allocation12]  }
  0x22   :  { %284 = vmatpush.bf16.msra.mxu1 %v893_v7  ;;  %v940_v34 = vld [vmem:[%s1259_s7] ss:$0 sm:$0xff]  ;;  %486 = vmatpush.bf16.msra.mxu3 %v911_v41  ;;  %v908_v52 = vld [vmem:[#allocation7 + $0x20] sm:$0xff]  ;;  %v919_v53 = vld [vmem:[#allocation7 + $0x78] sm:$0xff]  ;;  %s666_s7 = sshll.u32 %s1137_s4, 4  ;;  %s667_s7 = int_to_ptr.vmem [resolvable:$true] %s666_s7 }
  0x23   :  { %345 = vmatpush.bf16.msra.mxu2 %v901_v9  ;;  %v910_v42 = vld [vmem:[#allocation7 + $0x30] sm:$0xff]  ;;  %v907_v54 = vld [vmem:[#allocation7 + $0x18] sm:$0xff]  ;;  %v917_v57 = vld [vmem:[#allocation7 + $0x68] sm:$0xff] }
  0x24   :  { %v918_v55 = vld [vmem:[#allocation7 + $0x70] sm:$0xff]  ;;  %v905_v58 = vld [vmem:[#allocation7 + $0x8] sm:$0xff]  ;;  %v916_v59 = vld [vmem:[#allocation7 + $0x60] sm:$0xff] }
  0x25   :  { %185 = vmatpush.bf16.msra.mxu0 %v884_v8  ;;  %v906_v56 = vld [vmem:[#allocation7 + $0x10] sm:$0xff]  ;;  %v904_v60 = vld [vmem:[#allocation7] sm:$0xff]  ;;  %v915_v61 = vld [vmem:[#allocation7 + $0x58] sm:$0xff] }
  0x26   :  { %285 = vmatpush.bf16.msra.mxu1 %v892_v10  ;;  %487 = vmatpush.bf16.msra.mxu3 %v910_v42  ;;  %v914_v62 = vld [vmem:[#allocation7 + $0x50] sm:$0xff]  ;;  %v913_v63 = vld [vmem:[#allocation7 + $0x48] sm:$0xff]  ;;  %v912_v0 = vld [vmem:[#allocation7 + $0x40] sm:$0xff] }
  0x27   :  { %346 = vmatpush.bf16.msra.mxu2 %v900_v12  ;;  %v927_v2 = vld [vmem:[#allocation10 + $0x38] sm:$0xff]  ;;  %v926_v3 = vld [vmem:[#allocation10 + $0x30] sm:$0xff]  ;;  %v925_v7 = vld [vmem:[#allocation10 + $0x28] sm:$0xff] }
  0x28   :  { %v941_v42 = vld [vmem:[%s1258_s6] ss:$0 sm:$0xff] }
  0x29   :  { %186 = vmatpush.bf16.msra.mxu0 %v883_v11 }
  0x2a   :  { %286 = vmatpush.bf16.msra.mxu1 %v891_v13  ;;  %488 = vmatpush.bf16.msra.mxu3 %v909_v44  ;;  %v924_v13 = vld [vmem:[#allocation10 + $0x20] sm:$0xff] }
  0x2b   :  { %347 = vmatpush.bf16.msra.mxu2 %v899_v15 }
  0x2d   :  { %187 = vmatpush.bf16.msra.mxu0 %v882_v14 }
  0x2e   :  { %287 = vmatpush.bf16.msra.mxu1 %v890_v16  ;;  %489 = vmatpush.bf16.msra.mxu3 %v908_v52 }
  0x2f   :  { %348 = vmatpush.bf16.msra.mxu2 %v898_v24 }
  0x31   :  { %188 = vmatpush.bf16.msra.mxu0 %v881_v17 }
  0x32   :  { %288 = vmatpush.bf16.msra.mxu1 %v889_v18  ;;  %490 = vmatpush.bf16.msra.mxu3 %v907_v54  ;;  %v923_v18 = vld [vmem:[#allocation10 + $0x18] sm:$0xff] }
  0x33   :  { %349 = vmatpush.bf16.msra.mxu2 %v897_v25 }
  0x35   :  { %189 = vmatpush.bf16.msra.mxu0 %v880_v19 }
  0x36   :  { %289 = vmatpush.bf16.msra.mxu1 %v888_v23  ;;  %491 = vmatpush.bf16.msra.mxu3 %v906_v56 }
  0x37   :  { %350 = vmatpush.bf16.msra.mxu2 %v896_v26 }
  0x38   :  { %190 = vmatmul.bf16.vlgmr.msra.gmra.mxu0 %v113_v22 }
  0x39   :  { %547 = vmatpush.bf16.msrb.mxu0 %v919_v53 }
  0x3a   :  { %492 = vmatpush.bf16.msra.mxu3 %v905_v58  ;;  %629 = vmatpush.bf16.msrb.mxu1 %v927_v2 }
  0x3d   :  { %548 = vmatpush.bf16.msrb.mxu0 %v918_v55 }
  0x3e   :  { %493 = vmatpush.bf16.msra.mxu3 %v904_v60  ;;  %630 = vmatpush.bf16.msrb.mxu1 %v926_v3 }
  0x41   :  { %549 = vmatpush.bf16.msrb.mxu0 %v917_v57 }
  0x42   :  { %631 = vmatpush.bf16.msrb.mxu1 %v925_v7 }
  0x45   :  { %550 = vmatpush.bf16.msrb.mxu0 %v916_v59 }
  0x46   :  { %632 = vmatpush.bf16.msrb.mxu1 %v924_v13 }
  0x49   :  { %551 = vmatpush.bf16.msrb.mxu0 %v915_v61 }
  0x4a   :  { %633 = vmatpush.bf16.msrb.mxu1 %v923_v18 }
  0x4d   :  { %552 = vmatpush.bf16.msrb.mxu0 %v914_v62 }
  0x51   :  { %553 = vmatpush.bf16.msrb.mxu0 %v913_v63 }
  0x55   :  { %554 = vmatpush.bf16.msrb.mxu0 %v912_v0 }
  0xb5   :  { %v191_v28 = vpop.f32.mrf.mxu0 }
  0xb6   :  { %v192_v29 = vadd.f32 %v939_v27, %v191_v28 }
  0xb8   :  { %v196_v30 = vpack.c.bf16 %v192_v29, %v192_v29 }
  0xba   :  { %290 = vmatmul.bf16.vlgmr.msra.gmra.mxu1 %v196_v30 }
  0xbd   :  { %v193_v31 = vpop.f32.mrf.mxu0 }
  0xbe   :  { %v194_v32 = vadd.f32 %v939_v27, %v193_v31 }
  0xc0   :  { %v197_v33 = vpack.c.bf16 %v194_v32, %v194_v32 }
  0xc2   :  { %351 = vmatmul.bf16.vlgmr.msra.gmra.mxu2 %v197_v33 }
 0x137   :  { %v291_v35 = vpop.f32.mrf.mxu1 }
 0x138   :  { %v292_v36 = vadd.f32 %v940_v34, %v291_v35  ;;  %v921_v35 = vld [vmem:[#allocation10 + $0x8] sm:$0xff] }
 0x13a   :  { %356 = vmax.xlane.f32.xlu0 %v292_v36 }
 0x13f   :  { %v293_v37 = vpop.f32.mrf.mxu1 }
 0x145   :  { %v352_v38 = vpop.f32.mrf.mxu2 }
 0x146   :  { %v353_v39 = vadd.f32 %v940_v34, %v352_v38  ;;  %v922_v34 = vld [vmem:[#allocation10 + $0x10] sm:$0xff] }
 0x147   :  { %634 = vmatpush.bf16.msrb.mxu1 %v922_v34 }
 0x148   :  { %358 = vmax.xlane.f32.xlu0 %v353_v39 }
 0x14b   :  { %635 = vmatpush.bf16.msrb.mxu1 %v921_v35 }
 0x14d   :  { %v354_v40 = vpop.f32.mrf.mxu2 }
 0x1ad   :  { %v357_v43 = vpop.xlane.xlu0 %356 }
 0x1ae   :  { %v360_v45 = vsub.f32 %v292_v36, %v357_v43  ;;  %v920_v36 = vld [vmem:[#allocation10] sm:$0xff]  ;;  %v643_v43 = vmul.f32 0.70710677, %v1219_v20 }
 0x1af   :  { %636 = vmatpush.bf16.msrb.mxu1 %v920_v36 }
 0x1b0   :  { %v362_v46 = vmul.f32 1.442695, %v360_v45 }
 0x1b2   :  { %942 = vpow2.f32 %v362_v46 }
 0x1b8   :  { %v943_v47 = vpop.eup %942 }
 0x1b9   :  { %366 = vadd.xlane.f32.xlu1 %v943_v47 }
 0x1bb   :  { %v359_v48 = vpop.xlane.xlu0 %358 }
 0x1bc   :  { %v361_v49 = vsub.f32 %v353_v39, %v359_v48 }
 0x1be   :  { %v364_v50 = vmul.f32 1.442695, %v361_v49 }
 0x1c0   :  { %944 = vpow2.f32 %v364_v50 }
 0x1c6   :  { %v1231_v51 = vpop.eup %944 }
 0x1c7   :  { %368 = vadd.xlane.f32.xlu1 %v1231_v51 }
 0x22c   :  { %v367_v1 = vpop.xlane.xlu1 %366 }
 0x22d   :  { %946 = vrcp.f32 %v367_v1  ;;  %v381_v8 = vand.u32 2147483648, %v367_v1  ;;  %v379_v10 = vand.u32 2147483647, %v367_v1  ;;  %vm375_vm1 = vweird.f32 %v367_v1 }
 0x22f   :  { %v382_v14 = vor.u32 1.1754944e-38, %v381_v8  ;;  %vm380_vm3 = vcmp.eq.f32.partialorder %v379_v10, 8.507059e+37 }
 0x233   :  { %v947_v4 = vpop.eup %946 }
 0x234   :  { %v371_v5 = vmul.f32 %v947_v4, %v367_v1  ;;  %vm376_vm0 = vweird.f32 %v947_v4 }
 0x235   :  { %vm377_vm2 = vmor %vm375_vm1, %vm376_vm0 }
 0x236   :  { %v372_v6 = vsub.f32 1.0, %v371_v5 }
 0x238   :  { %v373_v9 = vmul.f32 %v947_v4, %v372_v6 }
 0x23a   :  { %v369_v11 = vpop.xlane.xlu1 %368  ;;  %v374_v12 = vadd.f32 %v947_v4, %v373_v9 }
 0x23b   :  { %948 = vrcp.f32 %v369_v11  ;;  %v396_v25 = vand.u32 2147483648, %v369_v11  ;;  %v394_v27 = vand.u32 2147483647, %v369_v11  ;;  %vm390_vm5 = vweird.f32 %v369_v11 }
 0x23c   :  { %v378_v15 = vsel %vm377_vm2, %v947_v4, %v374_v12 }
 0x23d   :  { %v383_v16 = vsel %vm380_vm3, %v382_v14, %v378_v15  ;;  %v397_v29 = vor.u32 1.1754944e-38, %v396_v25  ;;  %vm395_vm7 = vcmp.eq.f32.partialorder %v394_v27, 8.507059e+37 }
 0x23e   :  { %v400_v17 = vmul.f32 %v943_v47, %v383_v16  ;;  %v644_v47 = vmul.f32 0.70710677, %v1221_v21 }
 0x240   :  { %402 = vst [vmem:[#allocation12] sm:$0xff] %v400_v17  ;;  %v404_v19 = vpack.c.bf16 %v400_v17, %v400_v17 }
 0x241   :  { %v949_v22 = vpop.eup %948 }
 0x242   :  { %v386_v23 = vmul.f32 %v949_v22, %v369_v11  ;;  %494 = vmatmul.bf16.vlgmr.msra.gmra.mxu3 %v404_v19  ;;  %vm391_vm4 = vweird.f32 %v949_v22 }
 0x243   :  { %vm392_vm6 = vmor %vm390_vm5, %vm391_vm4 }
 0x244   :  { %v387_v24 = vsub.f32 1.0, %v386_v23 }
 0x246   :  { %v388_v26 = vmul.f32 %v949_v22, %v387_v24 }
 0x248   :  { %v389_v28 = vadd.f32 %v949_v22, %v388_v26 }
 0x24a   :  { %v393_v30 = vsel %vm392_vm6, %v949_v22, %v389_v28 }
 0x24b   :  { %v398_v31 = vsel %vm395_vm7, %v397_v29, %v393_v30 }
 0x24c   :  { %v401_v32 = vmul.f32 %v1231_v51, %v398_v31 }
 0x24e   :  { %v405_v33 = vpack.c.bf16 %v401_v32, %v401_v32  ;;  %403 = vst [vmem:[#allocation12 + $0x8] sm:$0xff] %v401_v32 }
 0x24f   :  { %674 = dma.vmem_to_hbm [thread:$0]  %s667_s7, 256, %s669_s18, [#allocation13], %s1133_s27, %s1133_s27, %s1134_s28  }
 0x250   :  { %555 = vmatmul.bf16.vlgmr.msrb.gmra.mxu0 %v405_v33 }
 0x2c5   :  { %v495_v37 = vpop.f32.mrf.mxu3 }
 0x2cd   :  { %v497_v38 = vpop.f32.mrf.mxu3  ;;  %v556_v39 = vpop.f32.mrf.mxu0 }
 0x2ce   :  { %v560_v40 = vpack.c.bf16 %v556_v39, %v495_v37 }
 0x2d0   :  { %637 = vmatmul.bf16.vlgmr.msrb.gmra.mxu1 %v560_v40 }
 0x2d5   :  { %v558_v41 = vpop.f32.mrf.mxu0 }
 0x34d   :  { %v638_v44 = vpop.f32.mrf.mxu1 }
 0x34e   :  { %v639_v45 = vadd.f32 %v941_v42, %v638_v44 }
 0x350   :  { %v645_v46 = vadd.f32 %v643_v43, %v639_v45 }
 0x352   :  { %647 = vst [vmem:[#allocation11] sm:$0xff] %v645_v46 }
 0x355   :  { %v640_v48 = vpop.f32.mrf.mxu1 }
 0x356   :  { %v641_v49 = vadd.f32 %v941_v42, %v640_v48 }
 0x358   :  { %v646_v50 = vadd.f32 %v644_v47, %v641_v49 }
 0x35a   :  { %648 = vst [vmem:[#allocation11 + $0x8] sm:$0xff] %v646_v50 }
 0x35b   :  { %661 = dma.vmem_to_hbm [thread:$0]  %s654_s21, 256, %s656_s3, [#allocation4], %s1133_s27, %s1133_s27, %s1134_s28  }
 0x35c   :  { %1124 = dma.done.wait [#allocation4], 256  }
 0x35d   :  { %1125 = vsyncadd [#allocation4], 4294967040 }
 0x35e   :  { %1126 = dma.done.wait [#allocation13], 256  }
 0x35f   :  { %1127 = vsyncadd [#allocation13], 4294967040 }
 0x360   :  { %683 = vsyncpa [#allocation3], 1 }
 0x361   :  { %684 = vsyncpa [#allocation6], 1 }
 0x362   :  { %685 = vsyncpa [#allocation9], 1 }
 0x363   :  { %686 = vsyncpa [#allocation4], 1 }
 0x364   :  { %687 = vsyncpa [#allocation13], 1 }

</bundles_post_ra>
